<compile_context>
chip_gen: v5e
topology: v5e:2x2
jax: 0.10.0
libtpu: 0.0.40
codegen_flags: <defaults>
</compile_context>

<pallas_src>
import functools

import jax
import jax.numpy as jnp
from jax import lax
from jax.experimental import pallas as pl
from jax.experimental.pallas import tpu as pltpu


def _round_up(x, m):
    return pl.cdiv(x, m) * m


# --------------------------------------------------------------------------
# Kernels
# --------------------------------------------------------------------------
def _tied_linear_kernel(x_ref, w_ref, b_ref, o_ref):
    """Full-hidden, with bias: one MXU sweep per (m, v) output tile."""
    acc = lax.dot_general(
        x_ref[...], w_ref[...],
        dimension_numbers=(((1,), (1,)), ((), ())),   # contract hidden (lane) axis
        preferred_element_type=jnp.float32,
    )
    o_ref[...] = (acc + b_ref[...]).astype(o_ref.dtype)


def _tied_linear_kernel_nobias(x_ref, w_ref, o_ref):
    acc = lax.dot_general(
        x_ref[...], w_ref[...],
        dimension_numbers=(((1,), (1,)), ((), ())),
        preferred_element_type=jnp.float32,
    )
    o_ref[...] = acc.astype(o_ref.dtype)


def _tied_linear_kernel_ksplit(x_ref, w_ref, b_ref, o_ref, acc_ref):
    """Fallback when the hidden dim is too large to keep resident in VMEM."""
    k = pl.program_id(2)

    @pl.when(k == 0)
    def _():
        # Fold the bias into the accumulator init (no epilogue add/broadcast).
        acc_ref[...] = jnp.broadcast_to(b_ref[...], acc_ref.shape)

    acc_ref[...] += lax.dot_general(
        x_ref[...], w_ref[...],
        dimension_numbers=(((1,), (1,)), ((), ())),
        preferred_element_type=jnp.float32,
    )

    @pl.when(k == pl.num_programs(2) - 1)
    def _():
        o_ref[...] = acc_ref[...].astype(o_ref.dtype)


def _tied_linear_kernel_ksplit_nobias(x_ref, w_ref, o_ref, acc_ref):
    k = pl.program_id(2)

    @pl.when(k == 0)
    def _():
        acc_ref[...] = jnp.zeros_like(acc_ref)

    acc_ref[...] += lax.dot_general(
        x_ref[...], w_ref[...],
        dimension_numbers=(((1,), (1,)), ((), ())),
        preferred_element_type=jnp.float32,
    )

    @pl.when(k == pl.num_programs(2) - 1)
    def _():
        o_ref[...] = acc_ref[...].astype(o_ref.dtype)


# --------------------------------------------------------------------------
# Generation-aware VMEM budget & tile selection
# --------------------------------------------------------------------------
@functools.lru_cache(maxsize=None)
def _vmem_budget():
    """Returns (tile_budget_bytes, vmem_limit_bytes) for the local TPU."""
    cap = None
    try:
        info = pltpu.get_tpu_info()
        cap = int(getattr(info, "vmem_capacity_bytes", 0)) or None
    except Exception:
        cap = None
    if cap is None:
        cap = 64 * 1024 * 1024                       # conservative default
    if cap >= 96 * 1024 * 1024:                      # v5e / v6e: 128 MiB VMEM
        return 80 * 1024 * 1024, 100 * 1024 * 1024
    return 36 * 1024 * 1024, 48 * 1024 * 1024        # v7x: 64 MiB VMEM


def _choose_tiles(M, V, H, in_itemsize, out_itemsize, budget):
    """Pick (tm, tv, th).  th == round_up(H,128) means no reduction axis."""
    sub = {1: 32, 2: 16}.get(in_itemsize, 8)         # sublane packing per dtype
    Hp_full = _round_up(H, 128)

    def fits(tm_, tv_, th_, split_k):
        buf = 2 * (tm_ + tv_) * th_ * in_itemsize    # x & w tiles, double buffered
        buf += 2 * tm_ * tv_ * out_itemsize          # output tile (out dtype!)
        buf += 2 * tv_ * 4                           # f32 bias tile
        if split_k:
            buf += tm_ * tv_ * 4                     # f32 accumulator scratch
        return buf <= budget

    # Vocab-tile candidates (lane-dense, <= padded vocab), largest first.  For
    # small/decode M prefer exact divisors of V (skips the weight pad copy);
    # for large training M the bigger tile wins (less x re-streaming).
    vcap = max(256, _round_up(V, 256))
    cands = [c for c in (1024, 512, 256) if c <= vcap] or [256]
    if M <= 1024:
        divs = [c for c in cands if V % c == 0]
        if divs:
            cands = divs + [c for c in cands if c not in divs]

    if M <= 512:
        tm_cands = [_round_up(M, sub)]               # whole M slab resident
    else:
        tm_cands = [512, 256]

    # Preferred: whole hidden resident -> single MXU sweep, no k axis.
    for tv in cands:
        for tm in tm_cands:
            if fits(tm, tv, Hp_full, False):
                return tm, tv, Hp_full

    # Shrink tm (down to the sublane pack) before giving up on full-H.
    tm = tm_cands[-1]
    while tm > sub:
        tm = max(sub, _round_up(tm // 2, sub))
        if fits(tm, 256, Hp_full, False):
            return tm, 256, Hp_full

    # Fallback: split the hidden (reduction) axis; keep th MXU-friendly (>=512).
    tm = _round_up(min(M, 256), sub)
    for th in (2048, 1024, 512):
        for tv in cands:
            if fits(tm, tv, th, True):
                return tm, tv, th
    return _round_up(min(M, 64), sub), 256, 512      # last resort


# --------------------------------------------------------------------------
# Wrapper
# --------------------------------------------------------------------------
@jax.jit
def tied_output_embedding(x, weight, bias=None):
    """y = x @ weight.T + bias  (PyTorch F.linear / TiedOutputEmbedding).

    x: (..., H), weight: (V, H), bias: (V,) or None.  Returns (..., V) in
    x's dtype.  For bf16 MXU operands, cast x/weight once up front (the tied
    weight should be stored pre-cast); accumulation is always f32.
    """
    *lead, H = x.shape
    V, Hw = weight.shape
    assert H == Hw, "hidden dims must match"
    out_dtype = x.dtype

    x2d = x.reshape(-1, H)
    M = x2d.shape[0]
    in_itemsize = jnp.dtype(x2d.dtype).itemsize
    out_itemsize = jnp.dtype(out_dtype).itemsize

    budget, vmem_limit = _vmem_budget()
    tm, tv, th = _choose_tiles(M, V, H, in_itemsize, out_itemsize, budget)
    Hp = _round_up(H, th)
    nk = Hp // th
    Mp = _round_up(M, tm)
    Vp = _round_up(V, tv)
    grid_m, grid_v = Mp // tm, Vp // tv

    # Pad only when the tiles do not divide the logical dims; the tile chooser
    # prefers exact divisors so the common pre-shaped case copies nothing.
    x_p = x2d if (Mp == M and Hp == H) else (
        jnp.zeros((Mp, Hp), x2d.dtype).at[:M, :H].set(x2d))
    w_p = weight if (Vp == V and Hp == H) else (
        jnp.zeros((Vp, Hp), weight.dtype).at[:V, :H].set(weight))

    has_bias = bias is not None
    if has_bias:
        b2d = bias.astype(jnp.float32).reshape(1, V)   # f32 once, not per tile
        b_p = b2d if Vp == V else (
            jnp.zeros((1, Vp), jnp.float32).at[:, :V].set(b2d))

    cost = pl.CostEstimate(
        flops=2 * Mp * Vp * Hp,
        transcendentals=0,
        bytes_accessed=(Mp * Hp + Vp * Hp) * in_itemsize + Mp * Vp * out_itemsize,
    )
    cparams_kw = dict(vmem_limit_bytes=vmem_limit)

    if nk == 1:
        # Weight-stationary schedule: vocab (j) is the OUTER grid axis, so the
        # (tv, Hp) weight tile is DMA'd once and stays resident across the
        # inner M sweep; only the small x tile re-streams per vocab tile.
        kernel = _tied_linear_kernel if has_bias else _tied_linear_kernel_nobias
        in_specs = [
            pl.BlockSpec((tm, Hp), lambda j, i: (i, 0)),    # x   (inner-varying)
            pl.BlockSpec((tv, Hp), lambda j, i: (j, 0)),    # weight (stationary)
        ]
        args = [x_p, w_p]
        if has_bias:
            in_specs.append(pl.BlockSpec((1, tv), lambda j, i: (0, j)))
            args.append(b_p)
        out = pl.pallas_call(
            kernel,
            out_shape=jax.ShapeDtypeStruct((Mp, Vp), out_dtype),
            grid_spec=pltpu.PrefetchScalarGridSpec(
                num_scalar_prefetch=0,
                grid=(grid_v, grid_m),
                in_specs=in_specs,
                out_specs=pl.BlockSpec((tm, tv), lambda j, i: (i, j)),
            ),
            compiler_params=pltpu.CompilerParams(
                dimension_semantics=("parallel", "parallel"), **cparams_kw),
            cost_estimate=cost,
        )(*args)
    else:
        kernel = (_tied_linear_kernel_ksplit if has_bias
                  else _tied_linear_kernel_ksplit_nobias)
        in_specs = [
            pl.BlockSpec((tm, th), lambda j, i, k: (i, k)),   # x
            pl.BlockSpec((tv, th), lambda j, i, k: (j, k)),   # weight
        ]
        args = [x_p, w_p]
        if has_bias:
            in_specs.append(pl.BlockSpec((1, tv), lambda j, i, k: (0, j)))
            args.append(b_p)
        out = pl.pallas_call(
            kernel,
            out_shape=jax.ShapeDtypeStruct((Mp, Vp), out_dtype),
            grid_spec=pltpu.PrefetchScalarGridSpec(
                num_scalar_prefetch=0,
                grid=(grid_v, grid_m, nk),
                in_specs=in_specs,
                out_specs=pl.BlockSpec((tm, tv), lambda j, i, k: (i, j)),
                scratch_shapes=[pltpu.VMEM((tm, tv), jnp.float32)],
            ),
            compiler_params=pltpu.CompilerParams(
                dimension_semantics=("parallel", "parallel", "arbitrary"),
                **cparams_kw),
            cost_estimate=cost,
        )(*args)

    if Mp != M or Vp != V:
        out = out[:M, :V]
    return out.reshape(*lead, V)


# --------------------------------------------------------------------------
# Demo / correctness check
# --------------------------------------------------------------------------
if __name__ == "__main__":
    # Small, deterministic setup consistent with the module: vocab=256,
    # hidden=128, batch=2, seq=8.
    vocab, hidden = 256, 128
    batch, seq = 2, 8

    key = jax.random.PRNGKey(0)
    k_emb, k_x = jax.random.split(key)

    # nn.Embedding weight -> tied output weight; bias init to zeros (as in module).
    emb_weight = jax.random.normal(k_emb, (vocab, hidden), dtype=jnp.float32) * 0.02
    bias = jnp.zeros((vocab,), dtype=jnp.float32)
    x = jax.random.normal(k_x, (batch, seq, hidden), dtype=jnp.float32)

    y_ref = jnp.einsum("bsh,vh->bsv", x, emb_weight) + bias

    # f32 path with bias (tight tolerance).
    y = jax.block_until_ready(tied_output_embedding(x, emb_weight, bias))
    assert y.shape == (batch, seq, vocab), y.shape
    assert jnp.allclose(y, y_ref, atol=1e-4, rtol=1e-4), "mismatch vs reference (f32)"

    # bias=None path (module constructed with bias=False).
    y_nb = jax.block_until_ready(tied_output_embedding(x, emb_weight))
    assert jnp.allclose(y_nb, y_ref, atol=1e-4, rtol=1e-4), "mismatch (no bias)"

    # bf16 operand path: cast once up front (hoisted, as a tied weight would be
    # stored in production); f32 accumulation inside the kernel.
    x_bf = x.astype(jnp.bfloat16)
    w_bf = emb_weight.astype(jnp.bfloat16)
    y_bf = jax.block_until_ready(tied_output_embedding(x_bf, w_bf, bias))
    assert y_bf.shape == (batch, seq, vocab), y_bf.shape
    assert jnp.allclose(y_bf.astype(jnp.float32), y_ref, atol=2e-2, rtol=2e-2), \
        "mismatch vs reference (bf16)"

    # Non-divisible shapes exercise the pad/slice fallback path.
    v2, h2, m2 = 300, 96, 5
    k1, k2 = jax.random.split(jax.random.PRNGKey(1))
    w2 = jax.random.normal(k1, (v2, h2), dtype=jnp.float32) * 0.02
    x2 = jax.random.normal(k2, (m2, h2), dtype=jnp.float32)
    b2 = jnp.zeros((v2,), dtype=jnp.float32)
    y2 = jax.block_until_ready(tied_output_embedding(x2, w2, b2))
    y2_ref = x2 @ w2.T + b2
    assert y2.shape == (m2, v2), y2.shape
    assert jnp.allclose(y2, y2_ref, atol=1e-4, rtol=1e-4), "mismatch (ragged shapes)"

    print("KERNEL_OK")
</pallas_src>

<mosaic_0001>
module attributes {stable_mosaic.version = 11 : i64} {
  func.func @_tied_linear_kernel(%arg0: i32, %arg1: i32, %arg2: memref<16x128xf32, #tpu.memory_space<vmem>>, %arg3: memref<256x128xf32, #tpu.memory_space<vmem>>, %arg4: memref<1x256xf32, #tpu.memory_space<vmem>>, %arg5: memref<16x256xf32, #tpu.memory_space<vmem>>) attributes {dimension_semantics = [#tpu.dimension_semantics<parallel>, #tpu.dimension_semantics<parallel>], iteration_bounds = array<i64: 1, 1>, scalar_prefetch = 0 : i64, scratch_operands = 0 : i64, tpu.core_type = #tpu.core_type<tc>, window_params = [{transform_indices = @transform_0, window_bounds = array<i64: 16, 128>}, {transform_indices = @transform_1, window_bounds = array<i64: 256, 128>}, {transform_indices = @transform_2, window_bounds = array<i64: 1, 256>}, {transform_indices = @transform_3, window_bounds = array<i64: 16, 256>}]} {
    %c0 = arith.constant 0 : index
    %c0_0 = arith.constant 0 : index
    %0 = vector.load %arg2[%c0, %c0_0] : memref<16x128xf32, #tpu.memory_space<vmem>>, vector<16x128xf32>
    %c0_1 = arith.constant 0 : index
    %c0_2 = arith.constant 0 : index
    %1 = vector.load %arg3[%c0_1, %c0_2] : memref<256x128xf32, #tpu.memory_space<vmem>>, vector<256x128xf32>
    %cst = arith.constant dense<0.000000e+00> : vector<16x256xf32>
    %2 = tpu.matmul %0, %1, %cst {dimension_numbers = #tpu.dot_dimension_numbers<[1], [1], [0], [0], [0, 0, 1, 0], [], []>} : vector<16x128xf32>, vector<256x128xf32>, vector<16x256xf32> -> vector<16x256xf32>
    %c0_3 = arith.constant 0 : index
    %c0_4 = arith.constant 0 : index
    %3 = vector.load %arg4[%c0_3, %c0_4] : memref<1x256xf32, #tpu.memory_space<vmem>>, vector<1x256xf32>
    %4 = vector.broadcast %3 : vector<1x256xf32> to vector<16x256xf32>
    %5 = arith.addf %2, %4 : vector<16x256xf32>
    %c0_5 = arith.constant 0 : index
    %c0_6 = arith.constant 0 : index
    %6 = vector.load %arg5[%c0_5, %c0_6] : memref<16x256xf32, #tpu.memory_space<vmem>>, vector<16x256xf32>
    tpu.vector_store %arg5[%c0_5, %c0_6], %5 {strides = array<i32>} : memref<16x256xf32, #tpu.memory_space<vmem>>, vector<16x256xf32>,
    return
  }
  func.func @transform_0(%arg0: i32, %arg1: i32) -> (i32, i32) {
    %c0_i32 = arith.constant 0 : i32
    %c0_i32_0 = arith.constant 0 : i32
    return %arg1, %c0_i32 : i32, i32
  }
  func.func @transform_1(%arg0: i32, %arg1: i32) -> (i32, i32) {
    %c0_i32 = arith.constant 0 : i32
    %c0_i32_0 = arith.constant 0 : i32
    return %arg0, %c0_i32 : i32, i32
  }
  func.func @transform_2(%arg0: i32, %arg1: i32) -> (i32, i32) {
    %c0_i32 = arith.constant 0 : i32
    %c0_i32_0 = arith.constant 0 : i32
    return %c0_i32, %arg0 : i32, i32
  }
  func.func @transform_3(%arg0: i32, %arg1: i32) -> (i32, i32) {
    %c0_i32 = arith.constant 0 : i32
    return %arg1, %arg0 : i32, i32
  }
}

</mosaic_0001>

<bundles_post_ra>
// kernel: tied_output_embedding.1
= control target key start
LH: loop header
LB: loop body
LE: loop exit
PB: predicated region body
PF: predicated region fallthrough
CT: control target
= control target key end

     0   :  { %8 = vsyncpa [#allocation3], 0  ;;  %s313_s0 = inlined_call_operand.hbm [shape: f32[16,128], index: 0, kind: input, shape index: {}]   ;;  %s314_s1 = inlined_call_operand.hbm [shape: f32[256,128], index: 1, kind: input, shape index: {}]   ;;  %s315_s2 = inlined_call_operand.vmem [shape: f32[1,256], index: 2, kind: input, shape index: {}]   ;;  %s316_s3 = inlined_call_operand.hbm [shape: f32[16,256], index: 3, kind: output, shape index: {}]  }
   0x1   :  { %9 = vsyncpa [#allocation6], 0 }
   0x2   :  { %10 = vsyncpa [#allocation4], 0  ;;  %s15_s14 = sshll.u32 %s313_s0, 4  ;;  %s274_s15 = smov [#allocation2]   ;;  %s16_s14 = int_to_ptr.hbm [resolvable:$true] %s15_s14 }
   0x3   :  { %s17_s16 = sshll.u32 %s274_s15, 4  ;;  %s28_s19 = sshll.u32 %s314_s1, 4  ;;  %s18_s16 = int_to_ptr.vmem [resolvable:$true] %s17_s16  ;;  %s29_s19 = int_to_ptr.hbm [resolvable:$true] %s28_s19 }
   0x4   :  { %s275_s20 = smov 128   ;;  %s276_s21 = smov 8  }
   0x5   :  { %23 = dma.hbm_to_vmem [thread:$0]  %s16_s14, 256, %s18_s16, [#allocation3], %s275_s20, %s275_s20, %s276_s21  }
   0x6   :  { %s277_s22 = smov [#allocation5]  }
   0x7   :  { %s30_s23 = sshll.u32 %s277_s22, 4  ;;  %s31_s23 = int_to_ptr.vmem [resolvable:$true] %s30_s23 }
   0x8   :  { %36 = dma.hbm_to_vmem [thread:$0]  %s29_s19, 4096, %s31_s23, [#allocation6], %s275_s20, %s275_s20, %s276_s21  }
   0x9   :  { %268 = dma.done.wait [#allocation3], 256  }
   0xa   :  { %269 = vsyncadd [#allocation3], 4294967040 }
   0xb   :  { %270 = dma.done.wait [#allocation6], 4096  }
   0xc   :  { %271 = vsyncadd [#allocation6], 4294963200  ;;  %v64_v0 = vld [vmem:[#allocation5 + $0x78] sm:$0xff]  ;;  %v63_v2 = vld [vmem:[#allocation5 + $0x70] sm:$0xff]  ;;  %s278_s24 = smov [#allocation7]   ;;  %s143_s28 = sshll.u32 %s316_s3, 4  ;;  %s144_s28 = int_to_ptr.hbm [resolvable:$true] %s143_s28 }
   0xd   :  { %v80_v1 = vld [vmem:[#allocation5 + $0xf8] sm:$0xff]  ;;  %157 = vmatpush.xpose.msra.mxu2 %v64_v0  ;;  %v79_v3 = vld [vmem:[#allocation5 + $0xf0] sm:$0xff]  ;;  %87 = vmatpush.xpose.msra.mxu0 %v64_v0  ;;  %v62_v4 = vld [vmem:[#allocation5 + $0x68] sm:$0xff]  ;;  %s141_s25 = sshll.u32 %s278_s24, 4  ;;  %s280_s29 = smov 16   ;;  %s142_s25 = int_to_ptr.vmem [resolvable:$true] %s141_s25 }
   0xe   :  { %173 = vmatpush.xpose.msra.mxu3 %v80_v1  ;;  %110 = vmatpush.xpose.msra.mxu1 %v80_v1  ;;  %v78_v5 = vld [vmem:[#allocation5 + $0xe8] sm:$0xff]  ;;  %v61_v6 = vld [vmem:[#allocation5 + $0x60] sm:$0xff]  ;;  %v60_v8 = vld [vmem:[#allocation5 + $0x58] sm:$0xff] }
   0xf   :  { %v77_v7 = vld [vmem:[#allocation5 + $0xe0] sm:$0xff]  ;;  %v76_v9 = vld [vmem:[#allocation5 + $0xd8] sm:$0xff]  ;;  %v59_v10 = vld [vmem:[#allocation5 + $0x50] sm:$0xff] }
  0x10   :  { %v75_v11 = vld [vmem:[#allocation5 + $0xd0] sm:$0xff]  ;;  %v58_v12 = vld [vmem:[#allocation5 + $0x48] sm:$0xff]  ;;  %v57_v14 = vld [vmem:[#allocation5 + $0x40] sm:$0xff] }
  0x11   :  { %158 = vmatpush.xpose.msra.mxu2 %v63_v2  ;;  %88 = vmatpush.xpose.msra.mxu0 %v63_v2  ;;  %v74_v13 = vld [vmem:[#allocation5 + $0xc8] sm:$0xff]  ;;  %v73_v15 = vld [vmem:[#allocation5 + $0xc0] sm:$0xff]  ;;  %v56_v16 = vld [vmem:[#allocation5 + $0x38] sm:$0xff] }
  0x12   :  { %174 = vmatpush.xpose.msra.mxu3 %v79_v3  ;;  %111 = vmatpush.xpose.msra.mxu1 %v79_v3  ;;  %v72_v17 = vld [vmem:[#allocation5 + $0xb8] sm:$0xff]  ;;  %v55_v18 = vld [vmem:[#allocation5 + $0x30] sm:$0xff]  ;;  %v54_v20 = vld [vmem:[#allocation5 + $0x28] sm:$0xff] }
  0x13   :  { %v71_v19 = vld [vmem:[#allocation5 + $0xb0] sm:$0xff]  ;;  %v70_v21 = vld [vmem:[#allocation5 + $0xa8] sm:$0xff]  ;;  %v53_v22 = vld [vmem:[#allocation5 + $0x20] sm:$0xff] }
  0x14   :  { %v69_v23 = vld [vmem:[#allocation5 + $0xa0] sm:$0xff]  ;;  %v52_v24 = vld [vmem:[#allocation5 + $0x18] sm:$0xff]  ;;  %v51_v26 = vld [vmem:[#allocation5 + $0x10] sm:$0xff] }
  0x15   :  { %159 = vmatpush.xpose.msra.mxu2 %v62_v4  ;;  %89 = vmatpush.xpose.msra.mxu0 %v62_v4  ;;  %v68_v25 = vld [vmem:[#allocation5 + $0x98] sm:$0xff]  ;;  %v67_v27 = vld [vmem:[#allocation5 + $0x90] sm:$0xff]  ;;  %v50_v28 = vld [vmem:[#allocation5 + $0x8] sm:$0xff] }
  0x16   :  { %175 = vmatpush.xpose.msra.mxu3 %v78_v5  ;;  %112 = vmatpush.xpose.msra.mxu1 %v78_v5  ;;  %v66_v29 = vld [vmem:[#allocation5 + $0x88] sm:$0xff]  ;;  %v49_v30 = vld [vmem:[#allocation5] sm:$0xff]  ;;  %v48_v32 = vld [vmem:[#allocation2 + $0x8] sm:$0xff] }
  0x17   :  { %v65_v31 = vld [vmem:[#allocation5 + $0x80] sm:$0xff]  ;;  %v47_v33 = vld [vmem:[#allocation2] sm:$0xff] }
  0x18   :  { %v81_v34 = vld [vmem:[%s315_s2] sm:$0x3]  ;;  %s279_s2 = smov 256  }
  0x19   :  { %160 = vmatpush.xpose.msra.mxu2 %v61_v6  ;;  %90 = vmatpush.xpose.msra.mxu0 %v61_v6  ;;  %v83_v35 = vperm.slane %v81_v34, 0  ;;  %v84_v36 = vperm.slane %v81_v34, 1 }
  0x1a   :  { %176 = vmatpush.xpose.msra.mxu3 %v77_v7  ;;  %113 = vmatpush.xpose.msra.mxu1 %v77_v7 }
  0x1d   :  { %161 = vmatpush.xpose.msra.mxu2 %v60_v8  ;;  %91 = vmatpush.xpose.msra.mxu0 %v60_v8 }
  0x1e   :  { %177 = vmatpush.xpose.msra.mxu3 %v76_v9  ;;  %114 = vmatpush.xpose.msra.mxu1 %v76_v9 }
  0x21   :  { %162 = vmatpush.xpose.msra.mxu2 %v59_v10  ;;  %92 = vmatpush.xpose.msra.mxu0 %v59_v10 }
  0x22   :  { %178 = vmatpush.xpose.msra.mxu3 %v75_v11  ;;  %115 = vmatpush.xpose.msra.mxu1 %v75_v11 }
  0x25   :  { %163 = vmatpush.xpose.msra.mxu2 %v58_v12  ;;  %93 = vmatpush.xpose.msra.mxu0 %v58_v12 }
  0x26   :  { %179 = vmatpush.xpose.msra.mxu3 %v74_v13  ;;  %116 = vmatpush.xpose.msra.mxu1 %v74_v13 }
  0x29   :  { %164 = vmatpush.xpose.msra.mxu2 %v57_v14  ;;  %94 = vmatpush.xpose.msra.mxu0 %v57_v14 }
  0x2a   :  { %180 = vmatpush.xpose.msra.mxu3 %v73_v15  ;;  %117 = vmatpush.xpose.msra.mxu1 %v73_v15 }
  0x2d   :  { %165 = vmatpush.xpose.msra.mxu2 %v56_v16  ;;  %95 = vmatpush.xpose.msra.mxu0 %v56_v16 }
  0x2e   :  { %181 = vmatpush.xpose.msra.mxu3 %v72_v17  ;;  %118 = vmatpush.xpose.msra.mxu1 %v72_v17 }
  0x31   :  { %166 = vmatpush.xpose.msra.mxu2 %v55_v18  ;;  %96 = vmatpush.xpose.msra.mxu0 %v55_v18 }
  0x32   :  { %182 = vmatpush.xpose.msra.mxu3 %v71_v19  ;;  %119 = vmatpush.xpose.msra.mxu1 %v71_v19 }
  0x35   :  { %167 = vmatpush.xpose.msra.mxu2 %v54_v20  ;;  %97 = vmatpush.xpose.msra.mxu0 %v54_v20 }
  0x36   :  { %183 = vmatpush.xpose.msra.mxu3 %v70_v21  ;;  %120 = vmatpush.xpose.msra.mxu1 %v70_v21 }
  0x39   :  { %168 = vmatpush.xpose.msra.mxu2 %v53_v22  ;;  %98 = vmatpush.xpose.msra.mxu0 %v53_v22 }
  0x3a   :  { %184 = vmatpush.xpose.msra.mxu3 %v69_v23  ;;  %121 = vmatpush.xpose.msra.mxu1 %v69_v23 }
  0x3d   :  { %169 = vmatpush.xpose.msra.mxu2 %v52_v24  ;;  %99 = vmatpush.xpose.msra.mxu0 %v52_v24 }
  0x3e   :  { %185 = vmatpush.xpose.msra.mxu3 %v68_v25  ;;  %122 = vmatpush.xpose.msra.mxu1 %v68_v25 }
  0x41   :  { %170 = vmatpush.xpose.msra.mxu2 %v51_v26  ;;  %100 = vmatpush.xpose.msra.mxu0 %v51_v26 }
  0x42   :  { %186 = vmatpush.xpose.msra.mxu3 %v67_v27  ;;  %123 = vmatpush.xpose.msra.mxu1 %v67_v27 }
  0x45   :  { %171 = vmatpush.xpose.msra.mxu2 %v50_v28  ;;  %101 = vmatpush.xpose.msra.mxu0 %v50_v28 }
  0x46   :  { %187 = vmatpush.xpose.msra.mxu3 %v66_v29  ;;  %124 = vmatpush.xpose.msra.mxu1 %v66_v29 }
  0x49   :  { %172 = vmatpush.xpose.msra.mxu2 %v49_v30  ;;  %102 = vmatpush.xpose.msra.mxu0 %v49_v30 }
  0x4a   :  { %188 = vmatpush.xpose.msra.mxu3 %v65_v31  ;;  %125 = vmatpush.xpose.msra.mxu1 %v65_v31 }
  0x4c   :  { %106 = vmatmul.f32.vlgmr.msra.gmra.mxu2 %v48_v32  ;;  %103 = vmatmul.f32.vlgmr.msra.gmra.mxu0 %v47_v33 }
  0x4d   :  { %129 = vmatmul.f32.vlgmr.msra.gmra.mxu3 %v48_v32  ;;  %126 = vmatmul.f32.vlgmr.msra.gmra.mxu1 %v47_v33 }
  0xc9   :  { %v104_v37 = vpop.f32.mrf.mxu0 }
  0xca   :  { %v127_v38 = vpop.f32.mrf.mxu1  ;;  %v105_v39 = vadd.f32 %v104_v37, %v83_v35 }
  0xcb   :  { %v128_v40 = vadd.f32 %v127_v38, %v84_v36 }
  0xcc   :  { %133 = vst [vmem:[#allocation7] sm:$0xff] %v105_v39 }
  0xcd   :  { %134 = vst [vmem:[#allocation7 + $0x8] sm:$0xff] %v128_v40 }
  0xcf   :  { %v107_v41 = vpop.f32.mrf.mxu2 }
  0xd0   :  { %v130_v42 = vpop.f32.mrf.mxu3  ;;  %v108_v43 = vadd.f32 %v107_v41, %v83_v35 }
  0xd1   :  { %v131_v44 = vadd.f32 %v130_v42, %v84_v36 }
  0xd2   :  { %135 = vst [vmem:[#allocation7 + $0x10] sm:$0xff] %v108_v43 }
  0xd3   :  { %136 = vst [vmem:[#allocation7 + $0x18] sm:$0xff] %v131_v44 }
  0xd4   :  { %149 = dma.vmem_to_hbm [thread:$0]  %s142_s25, 512, %s144_s28, [#allocation4], %s279_s2, %s279_s2, %s280_s29  }
  0xd5   :  { %272 = dma.done.wait [#allocation4], 512  }
  0xd6   :  { %273 = vsyncadd [#allocation4], 4294966784 }
  0xd7   :  { %154 = vsyncpa [#allocation3], 1 }
  0xd8   :  { %155 = vsyncpa [#allocation6], 1 }
  0xd9   :  { %156 = vsyncpa [#allocation4], 1 }

</bundles_post_ra>
